<compile_context>
chip_gen: v6e
topology: v6e:2x2x1
jax: 0.10.0
libtpu: 0.0.40
codegen_flags: <defaults>
</compile_context>

<pallas_src>
import functools

import jax
import jax.numpy as jnp
from jax import lax
from jax.experimental import pallas as pl
from jax.experimental.pallas import tpu as pltpu

DROPOUT_P = 0.8
_KEEP_SCALE = 1.0 / (1.0 - DROPOUT_P)            # survivor scale (train-mode dropout)
_DROP_THRESH_24 = int(DROPOUT_P * (1 << 24))     # keep element iff hash>>8 >= threshold

_HASH_M1 = 0x7FEB352D                # fits in int32
_HASH_M2 = 0x846CA68B - (1 << 32)    # 0x846CA68B reinterpreted as int32 (wraps)


def _hash_i32(x):
    """lowbias32-style mixer; int32 in, well-mixed int32 out (wrapping mul ok)."""
    s16 = jnp.int32(16)
    s15 = jnp.int32(15)
    x = x ^ lax.shift_right_logical(x, s16)
    x = x * jnp.int32(_HASH_M1)
    x = x ^ lax.shift_right_logical(x, s15)
    x = x * jnp.int32(_HASH_M2)
    x = x ^ lax.shift_right_logical(x, s16)
    return x


def _sdpa_dropout_kernel(seed_ref, q_ref, k_ref, inv_ref, v_ref, o_ref, *,
                         batch_block, m_tile, m_total, n_total):
    bb = pl.program_id(0)   # batch-block index
    mi = pl.program_id(1)   # query-row tile index

    q = q_ref[...]      # (Bt, TM, K)
    k = k_ref[...]      # (Bt, N,  K)
    inv = inv_ref[...]  # (Bt, 1,  N)
    v = v_ref[...]      # (Bt, N,  Dv)

    # qk = query @ key^T (batched); contraction over last dims, no transpose copy.
    qk = jnp.einsum("bmk,bnk->bmn", q, k, preferred_element_type=jnp.float32)

    # scaled = qk / inv_scale_factor: reciprocal of the small (Bt,1,N) row once,
    # then a broadcast multiply over the (TM,N) tile.
    scaled = qk * (1.0 / inv)

    # Numerically-stable softmax over the last dim; fold the dropout survivor
    # scale 1/(1-p) into the per-row normalizer (M reciprocal-divides, not M*N).
    m = jnp.max(scaled, axis=-1, keepdims=True)
    e = jnp.exp(scaled - m)
    l = jnp.sum(e, axis=-1, keepdims=True)
    p_scaled = e * (_KEEP_SCALE / l)             # softmax * 1/(1-p)

    # Dropout mask from a counter-based hash: unique counter per (batch,row,col),
    # seeded from the prefetched scalar. Integer threshold compare (no float path).
    shape = p_scaled.shape                       # (Bt, TM, N)
    b_ids = lax.broadcasted_iota(jnp.int32, shape, 0) + bb * batch_block
    r_ids = lax.broadcasted_iota(jnp.int32, shape, 1) + mi * m_tile
    c_ids = lax.broadcasted_iota(jnp.int32, shape, 2)
    counter = seed_ref[0] + (b_ids * m_total + r_ids) * n_total + c_ids
    r24 = lax.shift_right_logical(_hash_i32(counter), jnp.int32(8))  # in [0, 2^24)
    keep = r24 >= _DROP_THRESH_24
    dropped = jnp.where(keep, p_scaled, 0.0)

    # output = dropout(softmax(scaled)) @ value
    out = jnp.einsum("bmn,bnd->bmd", dropped, v, preferred_element_type=jnp.float32)
    o_ref[...] = out.astype(o_ref.dtype)


def _pick_tile(dim, cap=256):
    """Largest tile <= cap that divides dim and is a multiple of 8, else full dim."""
    if dim <= cap:
        return dim
    start = cap - (cap % 8)
    for t in range(start, 7, -8):
        if dim % t == 0:
            return t
    return dim


def sdpa_dropout(query, key, value, inv_scale_factor, seed=0):
    B, M, K = query.shape
    _, N, _ = key.shape
    Dv = value.shape[-1]

    # Query-row tiling keeps the (TM, N) scores/mask working set bounded (v7x VMEM).
    TM = _pick_tile(M, 256)
    # Small per-batch problems: process the whole batch per grid step to amortize
    # step overhead and raise MXU occupancy; large problems go one batch per step.
    Bt = B if (M * N <= 128 * 128) else 1

    kernel = functools.partial(
        _sdpa_dropout_kernel,
        batch_block=Bt, m_tile=TM, m_total=M, n_total=N,
    )

    grid_spec = pltpu.PrefetchScalarGridSpec(
        num_scalar_prefetch=1,
        grid=(B // Bt, M // TM),
        in_specs=[
            pl.BlockSpec((Bt, TM, K), lambda bb, mi, seed: (bb, mi, 0)),   # query
            pl.BlockSpec((Bt, N, K), lambda bb, mi, seed: (bb, 0, 0)),     # key
            pl.BlockSpec((Bt, 1, N), lambda bb, mi, seed: (bb, 0, 0)),     # inv scale
            pl.BlockSpec((Bt, N, Dv), lambda bb, mi, seed: (bb, 0, 0)),    # value
        ],
        out_specs=pl.BlockSpec((Bt, TM, Dv), lambda bb, mi, seed: (bb, mi, 0)),
    )

    seed_arr = jnp.array([seed], dtype=jnp.int32)
    return pl.pallas_call(
        kernel,
        out_shape=jax.ShapeDtypeStruct((B, M, Dv), jnp.float32),
        grid_spec=grid_spec,
        compiler_params=pltpu.CompilerParams(
            # Counter-based PRNG is independent of grid order -> fully parallel;
            # on v7x this shards work across both TensorCores.
            dimension_semantics=("parallel", "parallel"),
        ),
    )(seed_arr, query, key, inv_scale_factor, value)


if __name__ == "__main__":
    # Small, mutually-consistent shapes (the original script's literal shapes were
    # inconsistent; this preserves the intended semantics):
    #   query (B, M, K), key (B, N, K), value (B, N, Dv), inv_scale (B, 1, N)
    B, M, K, N, Dv = 2, 16, 32, 16, 32

    root = jax.random.PRNGKey(0)
    kq, kk, kv, ks = jax.random.split(root, 4)
    query = jax.random.normal(kq, (B, M, K), dtype=jnp.float32)
    key = jax.random.normal(kk, (B, N, K), dtype=jnp.float32)
    value = jax.random.normal(kv, (B, N, Dv), dtype=jnp.float32)
    inv_scale_factor = jax.random.normal(ks, (B, 1, N), dtype=jnp.float32)

    # TODO(synk): for very long N, an online (flash-style) softmax with N-tiling
    # would avoid materializing the (TM, N) probability tile; not needed at these sizes.
    out = sdpa_dropout(query, key, value, inv_scale_factor, seed=0)
    jax.block_until_ready(out)
    assert out.shape == (B, M, Dv)
    print("KERNEL_OK")
</pallas_src>

<mosaic_0001>
module attributes {stable_mosaic.version = 11 : i64} {
  func.func @_sdpa_dropout_kernel(%arg0: i32, %arg1: i32, %arg2: memref<1xi32, #tpu.memory_space<smem>>, %arg3: memref<2x16x32xf32, #tpu.memory_space<vmem>>, %arg4: memref<2x16x32xf32, #tpu.memory_space<vmem>>, %arg5: memref<2x1x16xf32, #tpu.memory_space<vmem>>, %arg6: memref<2x16x32xf32, #tpu.memory_space<vmem>>, %arg7: memref<2x16x32xf32, #tpu.memory_space<vmem>>) attributes {dimension_semantics = [#tpu.dimension_semantics<parallel>, #tpu.dimension_semantics<parallel>], iteration_bounds = array<i64: 1, 1>, scalar_prefetch = 1 : i64, scratch_operands = 0 : i64, tpu.core_type = #tpu.core_type<tc>, window_params = [{transform_indices = @transform_0, window_bounds = array<i64: 2, 16, 32>}, {transform_indices = @transform_1, window_bounds = array<i64: 2, 16, 32>}, {transform_indices = @transform_2, window_bounds = array<i64: 2, 1, 16>}, {transform_indices = @transform_3, window_bounds = array<i64: 2, 16, 32>}, {transform_indices = @transform_4, window_bounds = array<i64: 2, 16, 32>}]} {
    %c0 = arith.constant 0 : index
    %c0_0 = arith.constant 0 : index
    %c0_1 = arith.constant 0 : index
    %0 = vector.load %arg3[%c0, %c0_0, %c0_1] : memref<2x16x32xf32, #tpu.memory_space<vmem>>, vector<2x16x32xf32>
    %c0_2 = arith.constant 0 : index
    %c0_3 = arith.constant 0 : index
    %c0_4 = arith.constant 0 : index
    %1 = vector.load %arg4[%c0_2, %c0_3, %c0_4] : memref<2x16x32xf32, #tpu.memory_space<vmem>>, vector<2x16x32xf32>
    %c0_5 = arith.constant 0 : index
    %c0_6 = arith.constant 0 : index
    %c0_7 = arith.constant 0 : index
    %2 = vector.load %arg5[%c0_5, %c0_6, %c0_7] : memref<2x1x16xf32, #tpu.memory_space<vmem>>, vector<2x1x16xf32>
    %c0_8 = arith.constant 0 : index
    %c0_9 = arith.constant 0 : index
    %c0_10 = arith.constant 0 : index
    %3 = vector.load %arg6[%c0_8, %c0_9, %c0_10] : memref<2x16x32xf32, #tpu.memory_space<vmem>>, vector<2x16x32xf32>
    "tpu.trace_start"() <{level = 10 : i32, message = "bmk,bnk->bmn"}> : () -> ()
    %cst = arith.constant dense<0.000000e+00> : vector<2x16x16xf32>
    %4 = tpu.matmul %0, %1, %cst {dimension_numbers = #tpu.dot_dimension_numbers<[2], [2], [1], [1], [0, 0, 0, 1, 1, 1], [0], [0]>} : vector<2x16x32xf32>, vector<2x16x32xf32>, vector<2x16x16xf32> -> vector<2x16x16xf32>
    "tpu.trace_stop"() : () -> ()
    %cst_11 = arith.constant 1.000000e+00 : f32
    %5 = vector.broadcast %cst_11 : f32 to vector<2x1x16xf32>
    %6 = arith.divf %5, %2 : vector<2x1x16xf32>
    %7 = vector.broadcast %6 : vector<2x1x16xf32> to vector<2x16x16xf32>
    %8 = arith.mulf %4, %7 : vector<2x16x16xf32>
    %cst_12 = arith.constant dense<0xFF800000> : vector<2x16xf32>
    %9 = vector.multi_reduction <maximumf>, %8, %cst_12 [2] : vector<2x16x16xf32> to vector<2x16xf32>
    %10 = vector.shape_cast %9 : vector<2x16xf32> to vector<2x16x1xf32>
    %11 = vector.broadcast %10 : vector<2x16x1xf32> to vector<2x16x16xf32>
    %12 = arith.subf %8, %11 : vector<2x16x16xf32>
    %13 = math.exp %12 : vector<2x16x16xf32>
    %cst_13 = arith.constant dense<0.000000e+00> : vector<2x16xf32>
    %14 = vector.multi_reduction <add>, %13, %cst_13 [2] : vector<2x16x16xf32> to vector<2x16xf32>
    %15 = vector.shape_cast %14 : vector<2x16xf32> to vector<2x16x1xf32>
    %cst_14 = arith.constant 5.000000e+00 : f32
    %16 = vector.broadcast %cst_14 : f32 to vector<2x16x1xf32>
    %17 = arith.divf %16, %15 : vector<2x16x1xf32>
    %18 = vector.broadcast %17 : vector<2x16x1xf32> to vector<2x16x16xf32>
    %19 = arith.mulf %13, %18 : vector<2x16x16xf32>
    %20 = tpu.iota {dimensions = array<i32: 0>} : vector<2x16x16xi32>
    %c2_i32 = arith.constant 2 : i32
    %21 = arith.muli %arg0, %c2_i32 : i32
    %22 = vector.broadcast %21 : i32 to vector<2x16x16xi32>
    %23 = arith.addi %20, %22 : vector<2x16x16xi32>
    %24 = tpu.iota {dimensions = array<i32: 1>} : vector<2x16x16xi32>
    %c16_i32 = arith.constant 16 : i32
    %25 = arith.muli %arg1, %c16_i32 : i32
    %26 = vector.broadcast %25 : i32 to vector<2x16x16xi32>
    %27 = arith.addi %24, %26 : vector<2x16x16xi32>
    %28 = tpu.iota {dimensions = array<i32: 2>} : vector<2x16x16xi32>
    %c0_15 = arith.constant 0 : index
    %29 = memref.load %arg2[%c0_15] : memref<1xi32, #tpu.memory_space<smem>>
    %c16_i32_16 = arith.constant 16 : i32
    %30 = vector.broadcast %c16_i32_16 : i32 to vector<2x16x16xi32>
    %31 = arith.muli %23, %30 : vector<2x16x16xi32>
    %32 = arith.addi %31, %27 : vector<2x16x16xi32>
    %c16_i32_17 = arith.constant 16 : i32
    %33 = vector.broadcast %c16_i32_17 : i32 to vector<2x16x16xi32>
    %34 = arith.muli %32, %33 : vector<2x16x16xi32>
    %35 = vector.broadcast %29 : i32 to vector<2x16x16xi32>
    %36 = arith.addi %35, %34 : vector<2x16x16xi32>
    %37 = arith.addi %36, %28 : vector<2x16x16xi32>
    %c16_i32_18 = arith.constant 16 : i32
    %38 = vector.broadcast %c16_i32_18 : i32 to vector<2x16x16xi32>
    %39 = arith.shrui %37, %38 : vector<2x16x16xi32>
    %40 = arith.xori %37, %39 : vector<2x16x16xi32>
    %c2146121005_i32 = arith.constant 2146121005 : i32
    %41 = vector.broadcast %c2146121005_i32 : i32 to vector<2x16x16xi32>
    %42 = arith.muli %40, %41 : vector<2x16x16xi32>
    %c15_i32 = arith.constant 15 : i32
    %43 = vector.broadcast %c15_i32 : i32 to vector<2x16x16xi32>
    %44 = arith.shrui %42, %43 : vector<2x16x16xi32>
    %45 = arith.xori %42, %44 : vector<2x16x16xi32>
    %c-2073254261_i32 = arith.constant -2073254261 : i32
    %46 = vector.broadcast %c-2073254261_i32 : i32 to vector<2x16x16xi32>
    %47 = arith.muli %45, %46 : vector<2x16x16xi32>
    %c16_i32_19 = arith.constant 16 : i32
    %48 = vector.broadcast %c16_i32_19 : i32 to vector<2x16x16xi32>
    %49 = arith.shrui %47, %48 : vector<2x16x16xi32>
    %50 = arith.xori %47, %49 : vector<2x16x16xi32>
    %c8_i32 = arith.constant 8 : i32
    %51 = vector.broadcast %c8_i32 : i32 to vector<2x16x16xi32>
    %52 = arith.shrui %50, %51 : vector<2x16x16xi32>
    %c13421772_i32 = arith.constant 13421772 : i32
    %53 = vector.broadcast %c13421772_i32 : i32 to vector<2x16x16xi32>
    %54 = arith.cmpi sge, %52, %53 : vector<2x16x16xi32>
    %cst_20 = arith.constant 0.000000e+00 : f32
    %55 = vector.broadcast %cst_20 : f32 to vector<2x16x16xf32>
    %56 = arith.select %54, %19, %55 : vector<2x16x16xi1>, vector<2x16x16xf32>
    "tpu.trace_start"() <{level = 10 : i32, message = "bmn,bnd->bmd"}> : () -> ()
    %cst_21 = arith.constant dense<0.000000e+00> : vector<2x16x32xf32>
    %57 = tpu.matmul %56, %3, %cst_21 {dimension_numbers = #tpu.dot_dimension_numbers<[2], [1], [1], [2], [0, 0, 0, 1, 1, 2], [0], [0]>} : vector<2x16x16xf32>, vector<2x16x32xf32>, vector<2x16x32xf32> -> vector<2x16x32xf32>
    "tpu.trace_stop"() : () -> ()
    %c0_22 = arith.constant 0 : index
    %c0_23 = arith.constant 0 : index
    %c0_24 = arith.constant 0 : index
    %58 = vector.load %arg7[%c0_22, %c0_23, %c0_24] : memref<2x16x32xf32, #tpu.memory_space<vmem>>, vector<2x16x32xf32>
    tpu.vector_store %arg7[%c0_22, %c0_23, %c0_24], %57 {strides = array<i32>} : memref<2x16x32xf32, #tpu.memory_space<vmem>>, vector<2x16x32xf32>,
    return
  }
  func.func @transform_0(%arg0: i32, %arg1: i32, %arg2: memref<1xi32, #tpu.memory_space<smem>>) -> (i32, i32, i32) {
    %c0_i32 = arith.constant 0 : i32
    %c0_i32_0 = arith.constant 0 : i32
    return %arg0, %arg1, %c0_i32 : i32, i32, i32
  }
  func.func @transform_1(%arg0: i32, %arg1: i32, %arg2: memref<1xi32, #tpu.memory_space<smem>>) -> (i32, i32, i32) {
    %c0_i32 = arith.constant 0 : i32
    %c0_i32_0 = arith.constant 0 : i32
    %c0_i32_1 = arith.constant 0 : i32
    return %arg0, %c0_i32, %c0_i32_0 : i32, i32, i32
  }
  func.func @transform_2(%arg0: i32, %arg1: i32, %arg2: memref<1xi32, #tpu.memory_space<smem>>) -> (i32, i32, i32) {
    %c0_i32 = arith.constant 0 : i32
    %c0_i32_0 = arith.constant 0 : i32
    %c0_i32_1 = arith.constant 0 : i32
    return %arg0, %c0_i32, %c0_i32_0 : i32, i32, i32
  }
  func.func @transform_3(%arg0: i32, %arg1: i32, %arg2: memref<1xi32, #tpu.memory_space<smem>>) -> (i32, i32, i32) {
    %c0_i32 = arith.constant 0 : i32
    %c0_i32_0 = arith.constant 0 : i32
    %c0_i32_1 = arith.constant 0 : i32
    return %arg0, %c0_i32, %c0_i32_0 : i32, i32, i32
  }
  func.func @transform_4(%arg0: i32, %arg1: i32, %arg2: memref<1xi32, #tpu.memory_space<smem>>) -> (i32, i32, i32) {
    %c0_i32 = arith.constant 0 : i32
    %c0_i32_0 = arith.constant 0 : i32
    return %arg0, %arg1, %c0_i32 : i32, i32, i32
  }
}

</mosaic_0001>

<bundles_post_ra>
// kernel: tpu_custom_call.1
= control target key start
LH: loop header
LB: loop body
LE: loop exit
PB: predicated region body
PF: predicated region fallthrough
CT: control target
= control target key end

     0   :  { %11 = vsyncpa [#allocation5], 0  ;;  %s868_s0 = inlined_call_operand.<no memory space> [shape: s32[1], index: 0, kind: input, shape index: {}]   ;;  %s869_s1 = inlined_call_operand.hbm [shape: f32[2,16,32], index: 1, kind: input, shape index: {}]   ;;  %s870_s2 = inlined_call_operand.hbm [shape: f32[2,16,32], index: 2, kind: input, shape index: {}]   ;;  %s871_s3 = inlined_call_operand.vmem [shape: f32[2,1,16], index: 3, kind: input, shape index: {}]   ;;  %s872_s4 = inlined_call_operand.hbm [shape: f32[2,16,32], index: 4, kind: input, shape index: {}]   ;;  %s873_s5 = inlined_call_operand.hbm [shape: f32[2,16,32], index: 5, kind: output, shape index: {}]  }
   0x1   :  { %12 = vsyncpa [#allocation8], 0 }
   0x2   :  { %13 = vsyncpa [#allocation6], 0  ;;  %s747_s18 = smov [#allocation7]   ;;  %s748_s20 = smov [#allocation4]  }
   0x3   :  { %s31_s19 = sshll.u32 %s747_s18, 4  ;;  %s19_s21 = sshll.u32 %s748_s20, 4  ;;  %s32_s19 = int_to_ptr.vmem [resolvable:$true] %s31_s19  ;;  %s20_s21 = int_to_ptr.vmem [resolvable:$true] %s19_s21 }
   0x4   :  { %s669_s22 = scalar_lea.vmem %s32_s19, 512  ;;  %p674_p1 = scmp.lt.s32.totalorder %s32_s19, %s32_s19 }
   0x5   :  { %p670_p0 = scmp.ne.s32.totalorder %s32_s19, %s669_s22  ;;  %p675_p2 = scmp.lt.s32.totalorder %s669_s22, %s669_s22 }
   0x7   :  { %p676_p3 = por %p675_p2, %p674_p1 }
   0x9   :  { %p677_p4 = pnand %p676_p3, %p670_p0 }
   0xb   :  { %680 = shalt.err (!%p677_p4)
}
   0xc   :  { %s749_s23 = smov 128   ;;  %s750_s24 = smov 8  }
   0xd   :  { %37 = dma.hbm_to_vmem [thread:$0]  %s870_s2, 512, %s32_s19, [#allocation8], %s749_s23, %s749_s23, %s750_s24  }
   0xe   :  { %s689_s27 = scalar_lea.vmem %s20_s21, 512  ;;  %p694_p6 = scmp.lt.s32.totalorder %s20_s21, %s20_s21 }
   0xf   :  { %p690_p5 = scmp.ne.s32.totalorder %s20_s21, %s689_s27  ;;  %p695_p7 = scmp.lt.s32.totalorder %s689_s27, %s689_s27 }
  0x11   :  { %p696_p8 = por %p695_p7, %p694_p6 }
  0x13   :  { %p697_p9 = pnand %p696_p8, %p690_p5 }
  0x15   :  { %700 = shalt.err (!%p697_p9)
}
  0x16   :  { %25 = dma.hbm_to_vmem [thread:$0]  %s869_s1, 512, %s20_s21, [#allocation5], %s749_s23, %s749_s23, %s750_s24  }
  0x17   :  { %s751_s30 = smov [#allocation9]  }
  0x18   :  { %s45_s6 = sshll.u32 %s751_s30, 4  ;;  %s46_s6 = int_to_ptr.vmem [resolvable:$true] %s45_s6 }
  0x19   :  { %s709_s7 = scalar_lea.vmem %s46_s6, 512  ;;  %p714_p11 = scmp.lt.s32.totalorder %s46_s6, %s46_s6 }
  0x1a   :  { %p710_p10 = scmp.ne.s32.totalorder %s46_s6, %s709_s7  ;;  %p715_p12 = scmp.lt.s32.totalorder %s709_s7, %s709_s7 }
  0x1c   :  { %p716_p13 = por %p715_p12, %p714_p11 }
  0x1e   :  { %p717_p0 = pnand %p716_p13, %p710_p10 }
  0x20   :  { %720 = shalt.err (!%p717_p0)
}
  0x21   :  { %51 = dma.hbm_to_vmem [thread:$0]  %s872_s4, 512, %s46_s6, [#allocation8], %s749_s23, %s749_s23, %s750_s24  }
  0x22   :  { %741 = dma.done.wait [#allocation5], 512  }
  0x23   :  { %742 = vsyncadd [#allocation5], 4294966784 }
  0x24   :  { %743 = dma.done.wait [#allocation8], 1024  }
  0x25   :  { %744 = vsyncadd [#allocation8], 4294966272  ;;  %vm75_vm0 = vcmask 261120   ;;  %v66_v0 = vld [vmem:[#allocation7 + $0x8] sm:$0xff]  ;;  %v68_v1 = vld [vmem:[#allocation7 + $0x18] sm:$0xff]  ;;  %v256_v10 = vlaneseq  ;;  %vm270_vm1 = vcmask 130048   ;;  %v342_v56 = vstv %s868_s0 }
  0x26   :  { %v65_v2 = vld [vmem:[#allocation7] sm:$0xff]  ;;  %607 = vmatprep.subr.msk.mxu0 %vm75_vm0, %v66_v0  ;;  %614 = vmatprep.subr.msk.mxu1 %vm75_vm0, %v68_v1  ;;  %v67_v3 = vld [vmem:[#allocation7 + $0x10] sm:$0xff]  ;;  %v62_v6 = vld [vmem:[#allocation4 + $0x8] sm:$0xff]  ;;  %s752_s0 = smov [#allocation10]  }
  0x27   :  { %v61_v4 = vld [vmem:[#allocation4] sm:$0xff]  ;;  %608 = vmatpush3.xpose.msk.msra.mxu0 %vm75_vm0, %v66_v0  ;;  %615 = vmatpush3.xpose.msk.msra.mxu1 %vm75_vm0, %v68_v1  ;;  %v63_v5 = vld [vmem:[#allocation4 + $0x10] sm:$0xff]  ;;  %v64_v7 = vld [vmem:[#allocation4 + $0x18] sm:$0xff]  ;;  %v820_v11 = vshrl.u32 %v256_v10, 7  ;;  %v330_v57 = vand.u32 127, %v256_v10  ;;  %s566_s12 = sshll.u32 %s752_s0, 4  ;;  %s567_s12 = int_to_ptr.vmem [resolvable:$true] %s566_s12 }
  0x28   :  { %609 = vmatprep.subr.msk.mxu0 %vm75_vm0, %v65_v2  ;;  %616 = vmatprep.subr.msk.mxu1 %vm75_vm0, %v67_v3  ;;  %v69_v8 = vld [vmem:[%s871_s3] sm:$0x1]  ;;  %v70_v9 = vld [vmem:[%s871_s3 + $0x1] sm:$0x1]  ;;  %v72_v49 = vld [vmem:[#allocation9 + $0x8] sm:$0xff]  ;;  %s721_s13 = scalar_lea.vmem %s567_s12, 512  ;;  %p726_p2 = scmp.lt.s32.totalorder %s567_s12, %s567_s12 }
  0x29   :  { %611 = vmatprep.mubr.msk.f32.mxu0 %vm75_vm0, %v61_v4  ;;  %618 = vmatprep.mubr.msk.f32.mxu1 %vm75_vm0, %v63_v5  ;;  %641 = vrcp.f32 %v69_v8  ;;  %v258_v13 = vsub.s32 0, %v820_v11  ;;  %v71_v50 = vld [vmem:[#allocation9] sm:$0xff]  ;;  %v74_v51 = vld [vmem:[#allocation9 + $0x18] sm:$0xff]  ;;  %v73_v52 = vld [vmem:[#allocation9 + $0x10] sm:$0xff]  ;;  %v338_v53 = vmul.u32 16, %v820_v11  ;;  %v336_v54 = vadd.s32 16, %v820_v11  ;;  %p722_p1 = scmp.ne.s32.totalorder %s567_s12, %s721_s13  ;;  %p727_p3 = scmp.lt.s32.totalorder %s721_s13, %s721_s13 }
  0x2a   :  { %643 = vrcp.f32 %v70_v9  ;;  %v324_v55 = vadd.s32 8, %v820_v11 }
  0x2b   :  { %610 = vmatpush3.xpose.msk.msra.mxu0 %vm75_vm0, %v65_v2  ;;  %617 = vmatpush3.xpose.msk.msra.mxu1 %vm75_vm0, %v67_v3  ;;  %v343_v58 = vadd.s32 %v342_v56, %v338_v53  ;;  %v340_v59 = vmul.u32 16, %v336_v54  ;;  %p728_p4 = por %p727_p3, %p726_p2 }
  0x2c   :  { %621 = vmatprep.subr.mxu0 %v72_v49  ;;  %628 = vmatprep.subr.mxu1 %v74_v51  ;;  %v337_v60 = vadd.s32 16, %v324_v55  ;;  %v339_v61 = vmul.u32 16, %v324_v55 }
  0x2d   :  { %v347_v62 = vadd.s32 %v343_v58, %v330_v57  ;;  %v345_v63 = vadd.s32 %v342_v56, %v340_v59  ;;  %p729_p5 = pnand %p728_p4, %p722_p1 }
  0x2e   :  { %612 = vmatmul.mubr.msk.f32.vlgmr.msra.gmra.mxu0 %vm75_vm0, %v62_v6  ;;  %619 = vmatmul.mubr.msk.f32.vlgmr.msra.gmra.mxu1 %vm75_vm0, %v64_v7  ;;  %v341_v0 = vmul.u32 16, %v337_v60  ;;  %v344_v1 = vadd.s32 %v342_v56, %v339_v61 }
  0x2f   :  { %622 = vmatpush3.msra.mxu0 %v72_v49  ;;  %629 = vmatpush3.msra.mxu1 %v74_v51  ;;  %v351_v2 = vshrl.u32 %v347_v62, 16  ;;  %v349_v3 = vadd.s32 %v345_v63, %v330_v57 }
  0x30   :  { %623 = vmatprep.subr.mxu0 %v71_v50  ;;  %630 = vmatprep.subr.mxu1 %v73_v52  ;;  %v346_v4 = vadd.s32 %v342_v56, %v341_v0  ;;  %v348_v5 = vadd.s32 %v344_v1, %v330_v57 }
  0x31   :  { %624 = vmatpush3.msra.mxu0 %v71_v50  ;;  %631 = vmatpush3.msra.mxu1 %v73_v52  ;;  %v355_v6 = vxor.u32 %v351_v2, %v347_v62  ;;  %v353_v7 = vshrl.u32 %v349_v3, 16 }
  0x32   :  { %v350_v8 = vadd.s32 %v346_v4, %v330_v57  ;;  %v352_v9 = vshrl.u32 %v348_v5, 16 }
  0x33   :  { %v359_v11 = vmul.u32 2146121005, %v355_v6 }
  0x34   :  { %v356_v10 = vxor.u32 %v352_v9, %v348_v5 }
  0x36   :  { %v642_v12 = vpop.eup %641 }
  0x37   :  { %v644_v14 = vpop.eup %643  ;;  %v259_v15 = vrot.slane %v642_v12, %v258_v13  ;;  %v357_v12 = vxor.u32 %v353_v7, %v349_v3 }
  0x38   :  { %v263_v16 = vrot.slane %v644_v14, %v258_v13  ;;  %v354_v13 = vshrl.u32 %v350_v8, 16  ;;  %v363_v14 = vshrl.u32 %v359_v11, 15 }
  0xee   :  { %v613_v17 = vpop.f32.mrf.mxu0  ;;  %v620_v18 = vpop.f32.mrf.mxu1 }
  0xef   :  { %v267_v19 = vmul.f32 %v613_v17, %v259_v15  ;;  %v269_v20 = vmul.f32 %v620_v18, %v263_v16  ;;  %v360_v17 = vmul.u32 2146121005, %v356_v10  ;;  %v367_v18 = vxor.u32 %v363_v14, %v359_v11 }
  0xf0   :  { %v154_v21 = vpop.f32.mrf.mxu0  ;;  %v241_v22 = vpop.f32.mrf.mxu1 }
  0xf1   :  { %v266_v23 = vmul.f32 %v259_v15, %v154_v21  ;;  %v274_v24 = vsel %vm270_vm1, %v267_v19, -inf  ;;  %v268_v25 = vmul.f32 %v263_v16, %v241_v22  ;;  %v280_v27 = vsel %vm270_vm1, %v269_v20, -inf }
  0xf2   :  { %275 = vmax.xlane.f32.xlu1 %v274_v24  ;;  %v361_v15 = vmul.u32 2146121005, %v357_v12  ;;  %v358_v16 = vxor.u32 %v354_v13, %v350_v8  ;;  %v364_v21 = vshrl.u32 %v360_v17, 15 }
  0xf3   :  { %v271_v26 = vsel %vm270_vm1, %v266_v23, -inf  ;;  %v277_v28 = vsel %vm270_vm1, %v268_v25, -inf }
  0xf4   :  { %272 = vmax.xlane.f32.xlu0 %v271_v26  ;;  %v368_v26 = vxor.u32 %v364_v21, %v360_v17 }
  0xf6   :  { %281 = vmax.xlane.f32.xlu1 %v280_v27 }
  0xf8   :  { %278 = vmax.xlane.f32.xlu0 %v277_v28 }
 0x17b   :  { %v276_v29 = vpop.xlane.xlu1 %275 }
 0x17c   :  { %v284_v30 = vsub.f32 %v267_v19, %v276_v29  ;;  %v365_v19 = vshrl.u32 %v361_v15, 15 }
 0x17d   :  { %v273_v31 = vpop.xlane.xlu0 %272 }
 0x17e   :  { %v283_v32 = vsub.f32 %v266_v23, %v273_v31  ;;  %v289_v34 = vmul.f32 1.442695, %v284_v30  ;;  %v371_v23 = vmul.u32 2221713035, %v367_v18  ;;  %v369_v24 = vxor.u32 %v365_v19, %v361_v15 }
 0x17f   :  { %v282_v33 = vpop.xlane.xlu1 %281 }
 0x180   :  { %v287_v35 = vmul.f32 1.442695, %v283_v32  ;;  %v286_v36 = vsub.f32 %v269_v20, %v282_v33  ;;  %v362_v20 = vmul.u32 2146121005, %v358_v16  ;;  %v375_v29 = vshrl.u32 %v371_v23, 16 }
 0x181   :  { %v279_v37 = vpop.xlane.xlu0 %278  ;;  %v373_v30 = vmul.u32 2221713035, %v369_v24  ;;  %v372_v32 = vmul.u32 2221713035, %v368_v26 }
 0x182   :  { %645 = vpow2.f32 %v287_v35  ;;  %v285_v38 = vsub.f32 %v268_v25, %v279_v37  ;;  %v293_v39 = vmul.f32 1.442695, %v286_v36  ;;  %v366_v25 = vshrl.u32 %v362_v20, 15 }
 0x183   :  { %647 = vpow2.f32 %v289_v34  ;;  %v379_v34 = vxor.u32 %v375_v29, %v371_v23  ;;  %v377_v35 = vshrl.u32 %v373_v30, 16  ;;  %v376_v37 = vshrl.u32 %v372_v32, 16 }
 0x184   :  { %v291_v40 = vmul.f32 1.442695, %v285_v38  ;;  %v370_v31 = vxor.u32 %v366_v25, %v362_v20 }
 0x185   :  { %v383_v38 = vshrl.u32 %v379_v34, 8 }
 0x186   :  { %649 = vpow2.f32 %v291_v40  ;;  %v374_v36 = vmul.u32 2221713035, %v370_v31 }
 0x187   :  { %651 = vpow2.f32 %v293_v39  ;;  %v381_v39 = vxor.u32 %v377_v35, %v373_v30  ;;  %vm387_vm2 = vcmp.ge.s32.totalorder %v383_v38, 13421772 }
 0x188   :  { %v378_v40 = vshrl.u32 %v374_v36, 16 }
 0x18a   :  { %v382_v49 = vxor.u32 %v378_v40, %v374_v36 }
 0x18c   :  { %v386_v57 = vshrl.u32 %v382_v49, 8 }
 0x18e   :  { %vm390_vm5 = vcmp.ge.s32.totalorder %v386_v57, 13421772 }
 0x18f   :  { %v827_v41 = vpop.eup %645 }
 0x190   :  { %v295_v42 = vsel %vm270_vm1, %v827_v41, 0.0  ;;  %v831_v43 = vpop.eup %647 }
 0x191   :  { %296 = vadd.xlane.f32.xlu0 %v295_v42  ;;  %v298_v45 = vsel %vm270_vm1, %v831_v43, 0.0  ;;  %v380_v42 = vxor.u32 %v376_v37, %v372_v32 }
 0x193   :  { %v833_v44 = vpop.eup %649  ;;  %v384_v51 = vshrl.u32 %v380_v42, 8 }
 0x194   :  { %v301_v46 = vsel %vm270_vm1, %v833_v44, 0.0  ;;  %v839_v47 = vpop.eup %651 }
 0x195   :  { %299 = vadd.xlane.f32.xlu0 %v298_v45  ;;  %302 = vadd.xlane.f32.xlu1 %v301_v46  ;;  %v304_v48 = vsel %vm270_vm1, %v839_v47, 0.0  ;;  %vm388_vm4 = vcmp.ge.s32.totalorder %v384_v51, 13421772 }
 0x199   :  { %305 = vadd.xlane.f32.xlu1 %v304_v48  ;;  %v385_v48 = vshrl.u32 %v381_v39, 8 }
 0x19b   :  { %vm389_vm3 = vcmp.ge.s32.totalorder %v385_v48, 13421772 }
 0x21a   :  { %v297_v22 = vpop.xlane.xlu0 %296 }
 0x21b   :  { %653 = vrcp.f32 %v297_v22 }
 0x21e   :  { %v303_v27 = vpop.xlane.xlu1 %302  ;;  %v300_v28 = vpop.xlane.xlu0 %299 }
 0x21f   :  { %655 = vrcp.f32 %v303_v27 }
 0x220   :  { %657 = vrcp.f32 %v300_v28 }
 0x222   :  { %v306_v33 = vpop.xlane.xlu1 %305 }
 0x223   :  { %659 = vrcp.f32 %v306_v33 }
 0x228   :  { %v654_v45 = vpop.eup %653 }
 0x229   :  { %v308_v46 = vmul.f32 5.0, %v654_v45 }
 0x22b   :  { %v315_v50 = vmul.f32 %v827_v41, %v308_v46 }
 0x22c   :  { %v656_v52 = vpop.eup %655 }
 0x22d   :  { %v658_v53 = vpop.eup %657  ;;  %v312_v54 = vmul.f32 5.0, %v656_v52  ;;  %v391_v55 = vsel %vm387_vm2, %v315_v50, 0.0 }
 0x22e   :  { %v310_v56 = vmul.f32 5.0, %v658_v53  ;;  %625 = vmatprep.mubr.msk.f32.mxu0 %vm270_vm1, %v391_v55 }
 0x22f   :  { %v317_v58 = vmul.f32 %v833_v44, %v312_v54 }
 0x230   :  { %v660_v59 = vpop.eup %659  ;;  %v316_v60 = vmul.f32 %v831_v43, %v310_v56 }
 0x231   :  { %v314_v61 = vmul.f32 5.0, %v660_v59  ;;  %v393_v62 = vsel %vm389_vm3, %v317_v58, 0.0 }
 0x232   :  { %v392_v63 = vsel %vm388_vm4, %v316_v60, 0.0  ;;  %632 = vmatprep.mubr.msk.f32.mxu1 %vm270_vm1, %v393_v62 }
 0x233   :  { %v318_v41 = vmul.f32 %v839_v47, %v314_v61  ;;  %626 = vmatmul.mubr.msk.f32.vlgmr.msra.gmra.mxu0 %vm270_vm1, %v392_v63 }
 0x235   :  { %v394_v0 = vsel %vm390_vm5, %v318_v41, 0.0 }
 0x236   :  { %633 = vmatmul.mubr.msk.f32.vlgmr.msra.gmra.mxu1 %vm270_vm1, %v394_v0 }
 0x2f3   :  { %v627_v1 = vpop.f32.mrf.mxu0 }
 0x2f4   :  { %558 = vst.msk [vmem:[#allocation10 + $0x8] sm:$0xff] %vm75_vm0, %v627_v1 }
 0x2f5   :  { %v467_v44 = vpop.f32.mrf.mxu0 }
 0x2f6   :  { %557 = vst.msk [vmem:[#allocation10] sm:$0xff] %vm75_vm0, %v467_v44  ;;  %v634_v43 = vpop.f32.mrf.mxu1 }
 0x2f7   :  { %560 = vst.msk [vmem:[#allocation10 + $0x18] sm:$0xff] %vm75_vm0, %v634_v43 }
 0x2f8   :  { %v548_v2 = vpop.f32.mrf.mxu1 }
 0x2f9   :  { %559 = vst.msk [vmem:[#allocation10 + $0x10] sm:$0xff] %vm75_vm0, %v548_v2 }
 0x2fa   :  { %732 = shalt.err (!%p729_p5)
}
 0x2fb   :  { %572 = dma.vmem_to_hbm [thread:$0]  %s567_s12, 512, %s873_s5, [#allocation6], %s749_s23, %s749_s23, %s750_s24  }
 0x2fc   :  { %745 = dma.done.wait [#allocation6], 512  }
 0x2fd   :  { %746 = vsyncadd [#allocation6], 4294966784 }
 0x2fe   :  { %576 = vsyncpa [#allocation5], 1 }
 0x2ff   :  { %577 = vsyncpa [#allocation8], 1 }
 0x300   :  { %578 = vsyncpa [#allocation6], 1 }

</bundles_post_ra>
